<compile_context>
chip_gen: v6e
topology: v6e:2x2x1
jax: 0.10.0
libtpu: 0.0.40
codegen_flags: <defaults>
</compile_context>

<pallas_src>
import jax
import jax.numpy as jnp
from jax.experimental import pallas as pl
from jax.experimental.pallas import tpu as pltpu


def _silu(x):
    # SiLU / swish: x * sigmoid(x).  exp() and the approximate reciprocal both
    # lower to the EUP, keeping VPU slots free for the surrounding adds/muls.
    return x * pl.reciprocal(1.0 + jnp.exp(-x), approx=True)


def dense_network_kernel(x_ref, w1_ref, b1_ref, w2_ref, b2_ref, w3_ref, b3_ref,
                         o_ref):
    # Matmul operands are bf16; accumulation + elementwise epilogue in float32.
    x = x_ref[...]                                                   # (TB, 56)  bf16

    h1 = jnp.dot(x, w1_ref[...], preferred_element_type=jnp.float32)
    h1 = _silu(h1 + b1_ref[...])                                     # (TB, 128) f32

    h2 = jnp.dot(h1.astype(w2_ref.dtype), w2_ref[...],
                 preferred_element_type=jnp.float32)
    h2 = _silu(h2 + b2_ref[...])                                     # (TB, 32)  f32

    out = jnp.dot(h2.astype(w3_ref.dtype), w3_ref[...],
                  preferred_element_type=jnp.float32)
    out = out + b3_ref[...]                                          # (TB, 4)   f32

    o_ref[...] = out.astype(o_ref.dtype)


def _round_up(n, m):
    return ((n + m - 1) // m) * m


def dense_network_forward(x, params, *, tile_b=256, matmul_dtype=jnp.bfloat16):
    """x: (B, input_size) float32. params: W{i}: (in, out) and b{i}: (1, out)."""
    B = x.shape[0]
    out_size = params["W3"].shape[1]

    # Batch tile: multiple of 16 (bf16 sublane packing); never exceeds padded B.
    tile_b = min(tile_b, _round_up(B, 16))
    b_pad = _round_up(B, tile_b)
    if b_pad != B:
        x = jnp.pad(x, ((0, b_pad - B), (0, 0)))
    grid = (b_pad // tile_b,)

    # Matmul operands in bf16 (halves x DMA bytes); biases stay f32.
    x = x.astype(matmul_dtype)
    w1 = params["W1"].astype(matmul_dtype)
    w2 = params["W2"].astype(matmul_dtype)
    w3 = params["W3"].astype(matmul_dtype)
    b1 = params["b1"].astype(jnp.float32)
    b2 = params["b2"].astype(jnp.float32)
    b3 = params["b3"].astype(jnp.float32)

    vmem = pltpu.MemorySpace.VMEM
    # Weights / biases: constant block index -> loaded once, VMEM-resident.
    resident = lambda shape: pl.BlockSpec(shape, lambda i: (0, 0),
                                          memory_space=vmem)

    out = pl.pallas_call(
        dense_network_kernel,
        grid=grid,
        in_specs=[
            pl.BlockSpec((tile_b, x.shape[1]), lambda i: (i, 0),
                         memory_space=vmem),
            resident(w1.shape), resident(b1.shape),
            resident(w2.shape), resident(b2.shape),
            resident(w3.shape), resident(b3.shape),
        ],
        out_specs=pl.BlockSpec((tile_b, out_size), lambda i: (i, 0),
                               memory_space=vmem),
        out_shape=jax.ShapeDtypeStruct((b_pad, out_size), jnp.float32),
        compiler_params=pltpu.CompilerParams(
            dimension_semantics=("parallel",)),  # v7x: shard batch over both TCs
    )(x, w1, b1, w2, b2, w3, b3)

    return out[:B]


def init_params(key, input_size=56, hidden_units=(128, 32), output_size=4):
    """PyTorch nn.Linear default init: U(-k, k), k = 1/sqrt(fan_in).
    Weights stored as (in_features, out_features); biases as (1, out_features)."""
    sizes = [input_size, *hidden_units, output_size]
    params = {}
    for i in range(len(sizes) - 1):
        fan_in, fan_out = sizes[i], sizes[i + 1]
        key, kw, kb = jax.random.split(key, 3)
        bound = 1.0 / jnp.sqrt(jnp.float32(fan_in))
        params[f"W{i+1}"] = jax.random.uniform(
            kw, (fan_in, fan_out), jnp.float32, -bound, bound)
        params[f"b{i+1}"] = jax.random.uniform(
            kb, (1, fan_out), jnp.float32, -bound, bound)
    return params


def reference_forward(x, params, matmul_dtype=jnp.float32):
    """Pure-JAX reference.  matmul_dtype mirrors the kernel's bf16 operands."""
    def dot(a, w):
        return jnp.dot(a.astype(matmul_dtype), w.astype(matmul_dtype),
                       preferred_element_type=jnp.float32)
    h = jax.nn.silu(dot(x, params["W1"]) + params["b1"])
    h = jax.nn.silu(dot(h, params["W2"]) + params["b2"])
    return dot(h, params["W3"]) + params["b3"]


if __name__ == "__main__":
    key = jax.random.PRNGKey(0)
    kx, kp = jax.random.split(key)

    B, INPUT_SIZE = 128, 56
    x = jax.random.normal(kx, (B, INPUT_SIZE), dtype=jnp.float32)
    params = init_params(kp, input_size=INPUT_SIZE,
                         hidden_units=(128, 32), output_size=4)

    # Small tile so the test actually exercises the batch grid (grid=(4,)).
    out = dense_network_forward(x, params, tile_b=32)
    out = jax.block_until_ready(out)

    ref = reference_forward(x, params, matmul_dtype=jnp.bfloat16)
    assert out.shape == (B, 4), out.shape
    assert jnp.allclose(out, ref, atol=2e-2, rtol=2e-2), (
        "mismatch vs reference, max abs err = "
        f"{float(jnp.max(jnp.abs(out - ref)))}")

    print("KERNEL_OK")
</pallas_src>

<mosaic_0001>
module attributes {stable_mosaic.version = 11 : i64} {
  func.func @dense_network_kernel(%arg0: i32, %arg1: memref<32x56xbf16, #tpu.memory_space<vmem>>, %arg2: memref<56x128xbf16, #tpu.memory_space<vmem>>, %arg3: memref<1x128xf32, #tpu.memory_space<vmem>>, %arg4: memref<128x32xbf16, #tpu.memory_space<vmem>>, %arg5: memref<1x32xf32, #tpu.memory_space<vmem>>, %arg6: memref<32x4xbf16, #tpu.memory_space<vmem>>, %arg7: memref<1x4xf32, #tpu.memory_space<vmem>>, %arg8: memref<32x4xf32, #tpu.memory_space<vmem>>) attributes {dimension_semantics = [#tpu.dimension_semantics<parallel>], iteration_bounds = array<i64: 4>, scalar_prefetch = 0 : i64, scratch_operands = 0 : i64, tpu.core_type = #tpu.core_type<tc>, window_params = [{transform_indices = @transform_0, window_bounds = array<i64: 32, 56>}, {pipeline_mode = #tpu.pipeline_mode<synchronous>, transform_indices = @transform_1, window_bounds = array<i64: 56, 128>}, {pipeline_mode = #tpu.pipeline_mode<synchronous>, transform_indices = @transform_2, window_bounds = array<i64: 1, 128>}, {pipeline_mode = #tpu.pipeline_mode<synchronous>, transform_indices = @transform_3, window_bounds = array<i64: 128, 32>}, {pipeline_mode = #tpu.pipeline_mode<synchronous>, transform_indices = @transform_4, window_bounds = array<i64: 1, 32>}, {pipeline_mode = #tpu.pipeline_mode<synchronous>, transform_indices = @transform_5, window_bounds = array<i64: 32, 4>}, {pipeline_mode = #tpu.pipeline_mode<synchronous>, transform_indices = @transform_6, window_bounds = array<i64: 1, 4>}, {transform_indices = @transform_7, window_bounds = array<i64: 32, 4>}]} {
    %c0 = arith.constant 0 : index
    %c0_0 = arith.constant 0 : index
    %0 = vector.load %arg1[%c0, %c0_0] : memref<32x56xbf16, #tpu.memory_space<vmem>>, vector<32x56xbf16>
    %c0_1 = arith.constant 0 : index
    %c0_2 = arith.constant 0 : index
    %1 = vector.load %arg2[%c0_1, %c0_2] : memref<56x128xbf16, #tpu.memory_space<vmem>>, vector<56x128xbf16>
    %cst = arith.constant dense<0.000000e+00> : vector<32x128xf32>
    %2 = tpu.matmul %0, %1, %cst {dimension_numbers = #tpu.dot_dimension_numbers<[1], [0], [0], [1], [0, 0, 1, 1], [], []>} : vector<32x56xbf16>, vector<56x128xbf16>, vector<32x128xf32> -> vector<32x128xf32>
    %c0_3 = arith.constant 0 : index
    %c0_4 = arith.constant 0 : index
    %3 = vector.load %arg3[%c0_3, %c0_4] : memref<1x128xf32, #tpu.memory_space<vmem>>, vector<1x128xf32>
    %4 = vector.broadcast %3 : vector<1x128xf32> to vector<32x128xf32>
    %5 = arith.addf %2, %4 : vector<32x128xf32>
    %cst_5 = arith.constant 0.000000e+00 : f32
    %6 = vector.broadcast %cst_5 : f32 to vector<32x128xf32>
    %7 = arith.subf %6, %5 : vector<32x128xf32>
    %8 = math.exp %7 : vector<32x128xf32>
    %cst_6 = arith.constant 1.000000e+00 : f32
    %9 = vector.broadcast %cst_6 : f32 to vector<32x128xf32>
    %10 = arith.addf %9, %8 : vector<32x128xf32>
    %11 = tpu.reciprocal %10 {approx = true} : vector<32x128xf32> -> vector<32x128xf32>
    %12 = arith.mulf %5, %11 : vector<32x128xf32>
    %13 = arith.truncf %12 : vector<32x128xf32> to vector<32x128xbf16>
    %c0_7 = arith.constant 0 : index
    %c0_8 = arith.constant 0 : index
    %14 = vector.load %arg4[%c0_7, %c0_8] : memref<128x32xbf16, #tpu.memory_space<vmem>>, vector<128x32xbf16>
    %cst_9 = arith.constant dense<0.000000e+00> : vector<32x32xf32>
    %15 = tpu.matmul %13, %14, %cst_9 {dimension_numbers = #tpu.dot_dimension_numbers<[1], [0], [0], [1], [0, 0, 1, 1], [], []>} : vector<32x128xbf16>, vector<128x32xbf16>, vector<32x32xf32> -> vector<32x32xf32>
    %c0_10 = arith.constant 0 : index
    %c0_11 = arith.constant 0 : index
    %16 = vector.load %arg5[%c0_10, %c0_11] : memref<1x32xf32, #tpu.memory_space<vmem>>, vector<1x32xf32>
    %17 = vector.broadcast %16 : vector<1x32xf32> to vector<32x32xf32>
    %18 = arith.addf %15, %17 : vector<32x32xf32>
    %cst_12 = arith.constant 0.000000e+00 : f32
    %19 = vector.broadcast %cst_12 : f32 to vector<32x32xf32>
    %20 = arith.subf %19, %18 : vector<32x32xf32>
    %21 = math.exp %20 : vector<32x32xf32>
    %cst_13 = arith.constant 1.000000e+00 : f32
    %22 = vector.broadcast %cst_13 : f32 to vector<32x32xf32>
    %23 = arith.addf %22, %21 : vector<32x32xf32>
    %24 = tpu.reciprocal %23 {approx = true} : vector<32x32xf32> -> vector<32x32xf32>
    %25 = arith.mulf %18, %24 : vector<32x32xf32>
    %26 = arith.truncf %25 : vector<32x32xf32> to vector<32x32xbf16>
    %c0_14 = arith.constant 0 : index
    %c0_15 = arith.constant 0 : index
    %27 = vector.load %arg6[%c0_14, %c0_15] : memref<32x4xbf16, #tpu.memory_space<vmem>>, vector<32x4xbf16>
    %cst_16 = arith.constant dense<0.000000e+00> : vector<32x4xf32>
    %28 = tpu.matmul %26, %27, %cst_16 {dimension_numbers = #tpu.dot_dimension_numbers<[1], [0], [0], [1], [0, 0, 1, 1], [], []>} : vector<32x32xbf16>, vector<32x4xbf16>, vector<32x4xf32> -> vector<32x4xf32>
    %c0_17 = arith.constant 0 : index
    %c0_18 = arith.constant 0 : index
    %29 = vector.load %arg7[%c0_17, %c0_18] : memref<1x4xf32, #tpu.memory_space<vmem>>, vector<1x4xf32>
    %30 = vector.broadcast %29 : vector<1x4xf32> to vector<32x4xf32>
    %31 = arith.addf %28, %30 : vector<32x4xf32>
    %c0_19 = arith.constant 0 : index
    %c0_20 = arith.constant 0 : index
    %32 = vector.load %arg8[%c0_19, %c0_20] : memref<32x4xf32, #tpu.memory_space<vmem>>, vector<32x4xf32>
    tpu.vector_store %arg8[%c0_19, %c0_20], %31 {strides = array<i32>} : memref<32x4xf32, #tpu.memory_space<vmem>>, vector<32x4xf32>,
    return
  }
  func.func @transform_0(%arg0: i32) -> (i32, i32) {
    %c0_i32 = arith.constant 0 : i32
    %c0_i32_0 = arith.constant 0 : i32
    return %arg0, %c0_i32 : i32, i32
  }
  func.func @transform_1(%arg0: i32) -> (i32, i32) {
    %c0_i32 = arith.constant 0 : i32
    %c0_i32_0 = arith.constant 0 : i32
    %c0_i32_1 = arith.constant 0 : i32
    return %c0_i32, %c0_i32_0 : i32, i32
  }
  func.func @transform_2(%arg0: i32) -> (i32, i32) {
    %c0_i32 = arith.constant 0 : i32
    %c0_i32_0 = arith.constant 0 : i32
    %c0_i32_1 = arith.constant 0 : i32
    return %c0_i32, %c0_i32_0 : i32, i32
  }
  func.func @transform_3(%arg0: i32) -> (i32, i32) {
    %c0_i32 = arith.constant 0 : i32
    %c0_i32_0 = arith.constant 0 : i32
    %c0_i32_1 = arith.constant 0 : i32
    return %c0_i32, %c0_i32_0 : i32, i32
  }
  func.func @transform_4(%arg0: i32) -> (i32, i32) {
    %c0_i32 = arith.constant 0 : i32
    %c0_i32_0 = arith.constant 0 : i32
    %c0_i32_1 = arith.constant 0 : i32
    return %c0_i32, %c0_i32_0 : i32, i32
  }
  func.func @transform_5(%arg0: i32) -> (i32, i32) {
    %c0_i32 = arith.constant 0 : i32
    %c0_i32_0 = arith.constant 0 : i32
    %c0_i32_1 = arith.constant 0 : i32
    return %c0_i32, %c0_i32_0 : i32, i32
  }
  func.func @transform_6(%arg0: i32) -> (i32, i32) {
    %c0_i32 = arith.constant 0 : i32
    %c0_i32_0 = arith.constant 0 : i32
    %c0_i32_1 = arith.constant 0 : i32
    return %c0_i32, %c0_i32_0 : i32, i32
  }
  func.func @transform_7(%arg0: i32) -> (i32, i32) {
    %c0_i32 = arith.constant 0 : i32
    %c0_i32_0 = arith.constant 0 : i32
    return %arg0, %c0_i32 : i32, i32
  }
}

</mosaic_0001>

<bundles_post_ra>
// kernel: tpu_custom_call.1
= control target key start
LH: loop header
LB: loop body
LE: loop exit
PB: predicated region body
PF: predicated region fallthrough
CT: control target
= control target key end

     0   :  { %s903_s24 = smov 0   ;;  %s975_s0 = inlined_call_operand.vmem [shape: bf16[128,56], index: 0, kind: input, shape index: {}]   ;;  %s976_s1 = inlined_call_operand.vmem [shape: bf16[56,128], index: 1, kind: input, shape index: {}]   ;;  %s977_s2 = inlined_call_operand.vmem [shape: f32[1,128], index: 2, kind: input, shape index: {}]   ;;  %s978_s3 = inlined_call_operand.vmem [shape: bf16[128,32], index: 3, kind: input, shape index: {}]   ;;  %s979_s4 = inlined_call_operand.vmem [shape: f32[1,32], index: 4, kind: input, shape index: {}]   ;;  %s980_s5 = inlined_call_operand.vmem [shape: bf16[32,4], index: 5, kind: input, shape index: {}]   ;;  %s981_s6 = inlined_call_operand.vmem [shape: f32[1,4], index: 6, kind: input, shape index: {}]   ;;  %s982_s7 = inlined_call_operand.vmem [shape: f32[128,4], index: 7, kind: output, shape index: {}]  }
   0x1 LB: > { %s704_s25 = sadd.s32 4294967295, %s861_s24   ;;  %p708_p0 = scmp.ge.s32.totalorder %s861_s24, 1  ;;  %s861_s24 = sphi %s903_s24, %s17_s24  }
   0x2   : > { %p238_p1 = scmp.lt.s32.totalorder %s861_s24, 5 }
   0x4   : > { %p239_p2 = pnand %p708_p0, %p238_p1 }
   0x5   : > { %s709_s30 = sshll.u32 (!%p239_p2), %s704_s25, 2 }
   0x6   : > { %242 = sbr.rel (%p239_p2) target bundleno = 710 (0x2c6), region = 48  ;;  %p271_p3 = scmp.lt.s32.totalorder (!%p239_p2), %s709_s30, 15 }
   0xb   : > { %v807_v0 = vld [vmem:[%s976_s1 + $0x18] ss:$0 sps:$4 sm:$0xff]   ;;  %vm339_vm0 = vcmask 1043456   ;;  %v808_v1 = vld [vmem:[%s976_s1 + $0x10] sm:$0xff]   ;;  %v809_v3 = vld [vmem:[%s976_s1 + $0x8] sm:$0xff]   ;;  %s984_s30 = smov (!%p271_p3, %s709_s30), 15 }
   0xc   : > { %798 = vmatprep.subr.msk.bf16.mxu0 %vm339_vm0, %v807_v0  ;;  %v341_v2 = vsel %vm339_vm0, %v807_v0, 0  ;;  %v810_v4 = vld [vmem:[%s976_s1] sm:$0xff]   ;;  %s710_s12 = sshll.u32 %s984_s30, 2  ;;  %vm332_vm1 = vcmask 457728   ;;  %v813_v7 = vld [vmem:[%s978_s3 + $0x38] sm:$0xff]   ;;  %v814_v8 = vld [vmem:[%s978_s3 + $0x30] sm:$0xff]  }
   0xd   : > { %759 = vmatpush3.bf16.msra.mxu0 %v341_v2  ;;  %s274_s15 = scalar_lea.vmem %s975_s0, %s710_s12  ;;  %770 = vmatprep.subr.bf16.mxu1 %v813_v7  ;;  %v815_v9 = vld [vmem:[%s978_s3 + $0x28] sm:$0xff]   ;;  %v816_v10 = vld [vmem:[%s978_s3 + $0x20] sm:$0xff]   ;;  %v817_v11 = vld [vmem:[%s978_s3 + $0x18] sm:$0xff]   ;;  %vm587_vm2 = vcmask 261120   ;;  %s712_s19 = sshll.u32 %s984_s30, 3  ;;  %vm643_vm3 = vcmask 31744  }
   0xe   : > { %760 = vmatprep.subr.bf16.mxu0 %v808_v1  ;;  %v811_v5 = vld [vmem:[%s274_s15] sm:$0xff]   ;;  %v812_v6 = vld [vmem:[%s274_s15 + $0x8] sm:$0xff]   ;;  %771 = vmatpush3.bf16.msra.mxu1 %v813_v7  ;;  %v818_v12 = vld [vmem:[%s978_s3 + $0x10] sm:$0xff]   ;;  %s280_s25 = scalar_lea.vmem %s982_s7, %s712_s19 }
   0xf   : > { %766 = vmatprep.mubr.msk.bf16.mxu0 %vm332_vm1, %v811_v5  ;;  %772 = vmatprep.subr.bf16.mxu1 %v814_v8  ;;  %v819_v13 = vld [vmem:[%s978_s3 + $0x8] sm:$0xff]   ;;  %v820_v14 = vld [vmem:[%s978_s3] sm:$0xff]  }
  0x10   : > { %v713_v15 = vld [vmem:[%s977_s2] ss:$0 sm:$0xff]  ;;  %v821_v50 = vld [vmem:[%s980_s5 + $0x8] sm:$0xff]  }
  0x11   : > { %761 = vmatpush3.bf16.msra.mxu0 %v808_v1  ;;  %v822_v51 = vld [vmem:[%s980_s5] sm:$0xff]  }
  0x12   : > { %762 = vmatprep.subr.bf16.mxu0 %v809_v3  ;;  %773 = vmatpush3.bf16.msra.mxu1 %v814_v8  ;;  %v722_v52 = vld [vmem:[%s979_s4] ss:$0 sm:$0xff] }
  0x13   : > { %774 = vmatprep.subr.bf16.mxu1 %v815_v9 }
  0x15   : > { %763 = vmatpush3.bf16.msra.mxu0 %v809_v3 }
  0x16   : > { %764 = vmatprep.subr.bf16.mxu0 %v810_v4  ;;  %775 = vmatpush3.bf16.msra.mxu1 %v815_v9 }
  0x17   : > { %776 = vmatprep.subr.bf16.mxu1 %v816_v10 }
  0x19   : > { %765 = vmatpush3.bf16.msra.mxu0 %v810_v4 }
  0x1a   : > { %777 = vmatpush3.bf16.msra.mxu1 %v816_v10  ;;  %790 = vmatprep.subr.bf16.mxu0 %v821_v50 }
  0x1b   : > { %778 = vmatprep.subr.bf16.mxu1 %v817_v11 }
  0x1c   : > { %767 = vmatmul.mubr.msk.bf16.vlgmr.msra.gmra.mxu0 %vm332_vm1, %v812_v6 }
  0x1d   : > { %791 = vmatpush3.bf16.msra.mxu0 %v821_v50 }
  0x1e   : > { %779 = vmatpush3.bf16.msra.mxu1 %v817_v11  ;;  %792 = vmatprep.subr.bf16.mxu0 %v822_v51 }
  0x1f   : > { %780 = vmatprep.subr.bf16.mxu1 %v818_v12 }
  0x21   : > { %793 = vmatpush3.bf16.msra.mxu0 %v822_v51 }
  0x22   : > { %781 = vmatpush3.bf16.msra.mxu1 %v818_v12 }
  0x23   : > { %782 = vmatprep.subr.bf16.mxu1 %v819_v13 }
  0x26   : > { %783 = vmatpush3.bf16.msra.mxu1 %v819_v13 }
  0x27   : > { %784 = vmatprep.subr.bf16.mxu1 %v820_v14 }
  0x2a   : > { %785 = vmatpush3.bf16.msra.mxu1 %v820_v14 }
  0xdc   : > { %v768_v16 = vpop.f32.mrf.mxu0 }
  0xdd   : > { %v386_v17 = vadd.f32 %v768_v16, %v713_v15 }
  0xde   : > { %v377_v18 = vpop.f32.mrf.mxu0 }
  0xdf   : > { %v394_v19 = vsub.f32 0.0, %v386_v17  ;;  %v378_v20 = vadd.f32 %v713_v15, %v377_v18 }
  0xe0   : > { %v769_v21 = vpop.f32.mrf.mxu0 }
  0xe1   : > { %v400_v22 = vmul.f32 1.442695, %v394_v19  ;;  %v392_v23 = vsub.f32 0.0, %v378_v20  ;;  %v389_v24 = vadd.f32 %v769_v21, %v713_v15 }
  0xe2   : > { %v380_v25 = vpop.f32.mrf.mxu0 }
  0xe3   : > { %v396_v26 = vmul.f32 1.442695, %v392_v23  ;;  %v395_v27 = vsub.f32 0.0, %v389_v24  ;;  %v381_v28 = vadd.f32 %v713_v15, %v380_v25  ;;  %823 = vpow2.f32 %v400_v22  ;;  %v731_v23 = vld [vmem:[%s981_s6] ss:$0 sm:$0xff] }
  0xe5   : > { %825 = vpow2.f32 %v396_v26  ;;  %v402_v29 = vmul.f32 1.442695, %v395_v27  ;;  %v393_v30 = vsub.f32 0.0, %v381_v28 }
  0xe7   : > { %827 = vpow2.f32 %v402_v29  ;;  %v398_v31 = vmul.f32 1.442695, %v393_v30 }
  0xe9   : > { %829 = vpow2.f32 %v398_v31 }
  0xf0   : > { %v824_v32 = vpop.eup %823 }
  0xf1   : > { %v406_v36 = vadd.f32 1.0, %v824_v32 }
  0xf2   : > { %v826_v33 = vpop.eup %825 }
  0xf3   : > { %v404_v34 = vadd.f32 1.0, %v826_v33 }
  0xf4   : > { %v828_v35 = vpop.eup %827 }
  0xf5   : > { %v407_v37 = vadd.f32 1.0, %v828_v35  ;;  %831 = vrcp.f32 %v404_v34 }
  0xf6   : > { %v830_v38 = vpop.eup %829 }
  0xf7   : > { %833 = vrcp.f32 %v407_v37  ;;  %v405_v39 = vadd.f32 1.0, %v830_v38 }
  0xf8   : > { %835 = vrcp.f32 %v406_v36 }
  0xf9   : > { %837 = vrcp.f32 %v405_v39 }
 0x102   : > { %v832_v40 = vpop.eup %831 }
 0x103   : > { %v412_v45 = vmul.f32 %v832_v40, %v378_v20 }
 0x104   : > { %v834_v41 = vpop.eup %833 }
 0x105   : > { %v836_v42 = vpop.eup %835  ;;  %v415_v44 = vmul.f32 %v834_v41, %v389_v24 }
 0x106   : > { %v838_v43 = vpop.eup %837  ;;  %v414_v47 = vmul.f32 %v836_v42, %v386_v17 }
 0x107   : > { %v413_v46 = vmul.f32 %v838_v43, %v381_v28 }
 0x108   : > { %v417_v49 = vpack.c.bf16 %v415_v44, %v414_v47 }
 0x109   : > { %v416_v48 = vpack.c.bf16 %v413_v46, %v412_v45 }
 0x10b   : > { %786 = vmatprep.mubr.bf16.mxu1 %v416_v48 }
 0x10c   : > { %787 = vmatmul.mubr.bf16.vlgmr.msra.gmra.mxu1 %v417_v49 }
 0x1cc   : > { %v788_v53 = vpop.f32.mrf.mxu1 }
 0x1cd   : > { %v532_v54 = vadd.f32 %v788_v53, %v722_v52 }
 0x1ce   : > { %v523_v55 = vpop.f32.mrf.mxu1 }
 0x1cf   : > { %v540_v56 = vsub.f32 0.0, %v532_v54  ;;  %v524_v57 = vadd.f32 %v722_v52, %v523_v55 }
 0x1d0   : > { %v789_v58 = vpop.f32.mrf.mxu1 }
 0x1d1   : > { %v546_v59 = vmul.f32 1.442695, %v540_v56  ;;  %v538_v60 = vsub.f32 0.0, %v524_v57  ;;  %v535_v61 = vadd.f32 %v789_v58, %v722_v52 }
 0x1d2   : > { %v526_v62 = vpop.f32.mrf.mxu1 }
 0x1d3   : > { %v542_v63 = vmul.f32 1.442695, %v538_v60  ;;  %v541_v0 = vsub.f32 0.0, %v535_v61  ;;  %v527_v1 = vadd.f32 %v722_v52, %v526_v62  ;;  %839 = vpow2.f32 %v546_v59 }
 0x1d5   : > { %841 = vpow2.f32 %v542_v63  ;;  %v548_v2 = vmul.f32 1.442695, %v541_v0  ;;  %v539_v3 = vsub.f32 0.0, %v527_v1 }
 0x1d7   : > { %843 = vpow2.f32 %v548_v2  ;;  %v544_v4 = vmul.f32 1.442695, %v539_v3 }
 0x1d9   : > { %845 = vpow2.f32 %v544_v4 }
 0x1e0   : > { %v840_v5 = vpop.eup %839 }
 0x1e1   : > { %v552_v9 = vadd.f32 1.0, %v840_v5 }
 0x1e2   : > { %v842_v6 = vpop.eup %841 }
 0x1e3   : > { %v550_v7 = vadd.f32 1.0, %v842_v6 }
 0x1e4   : > { %v844_v8 = vpop.eup %843 }
 0x1e5   : > { %v553_v10 = vadd.f32 1.0, %v844_v8  ;;  %847 = vrcp.f32 %v550_v7 }
 0x1e6   : > { %v846_v11 = vpop.eup %845 }
 0x1e7   : > { %849 = vrcp.f32 %v553_v10  ;;  %v551_v12 = vadd.f32 1.0, %v846_v11 }
 0x1e8   : > { %851 = vrcp.f32 %v552_v9 }
 0x1e9   : > { %853 = vrcp.f32 %v551_v12 }
 0x1f2   : > { %v848_v13 = vpop.eup %847 }
 0x1f3   : > { %v558_v18 = vmul.f32 %v848_v13, %v524_v57 }
 0x1f4   : > { %v850_v14 = vpop.eup %849 }
 0x1f5   : > { %v852_v15 = vpop.eup %851  ;;  %v561_v17 = vmul.f32 %v850_v14, %v535_v61 }
 0x1f6   : > { %v854_v16 = vpop.eup %853  ;;  %v560_v20 = vmul.f32 %v852_v15, %v532_v54 }
 0x1f7   : > { %v559_v19 = vmul.f32 %v854_v16, %v527_v1 }
 0x1f8   : > { %v563_v22 = vpack.c.bf16 %v561_v17, %v560_v20 }
 0x1f9   : > { %v562_v21 = vpack.c.bf16 %v559_v19, %v558_v18 }
 0x1fb   : > { %794 = vmatprep.mubr.msk.bf16.mxu0 %vm587_vm2, %v562_v21 }
 0x1fc   : > { %795 = vmatmul.mubr.msk.bf16.vlgmr.msra.gmra.mxu0 %vm587_vm2, %v563_v22 }
 0x2bc   : > { %v796_v24 = vpop.f32.mrf.mxu0 }
 0x2bd   : > { %v637_v25 = vadd.f32 %v796_v24, %v731_v23 }
 0x2be   : > { %v628_v26 = vpop.f32.mrf.mxu0 }
 0x2bf   : > { %646 = vst.msk [vmem:[%s280_s25 + $0x10] sm:$0xff] %vm643_vm3, %v637_v25  ;;  %v629_v27 = vadd.f32 %v731_v23, %v628_v26 }
 0x2c0   : > { %v797_v28 = vpop.f32.mrf.mxu0 }
 0x2c1   : > { %644 = vst.msk [vmem:[%s280_s25] sm:$0xff] %vm643_vm3, %v629_v27  ;;  %v640_v29 = vadd.f32 %v797_v28, %v731_v23 }
 0x2c2   : > { %v631_v30 = vpop.f32.mrf.mxu0 }
 0x2c3   : > { %647 = vst.msk [vmem:[%s280_s25 + $0x18] sm:$0xff] %vm643_vm3, %v640_v29  ;;  %v632_v31 = vadd.f32 %v731_v23, %v631_v30 }
 0x2c5   : > { %645 = vst.msk [vmem:[%s280_s25 + $0x8] sm:$0xff] %vm643_vm3, %v632_v31 }
 0x2c6 PF: > { %s17_s24 = sadd.s32 1, %s861_s24  }
 0x2c7   : > { %p14_p4 = scmp.ge.s32.totalorder %s17_s24, 6  }
 0x2c9   :  { %16 = sbr.rel (!%p14_p4) target bundleno = 1 (0x1), region = 78 }

</bundles_post_ra>
